<compile_context>
chip_gen: v7x
topology: tpu7x:2x2x1
jax: 0.10.0
libtpu: 0.0.40
codegen_flags: <defaults>
</compile_context>

<pallas_src>
import functools

import jax
import jax.numpy as jnp
from jax.experimental import pallas as pl
from jax.experimental.pallas import tpu as pltpu

LANE = 128


def _round_up(n, m):
    return ((n + m - 1) // m) * m


def _vmem_capacity_bytes(default=64 * 1024 * 1024):
    try:
        info = pltpu.get_tpu_info()
        return int(getattr(info, "vmem_capacity_bytes", default))
    except Exception:
        return default


# ---------------------------------------------------------------------------
# Kernel
# ---------------------------------------------------------------------------
def cvae_kernel(x_ref, cond_ref, eps_ref,
                w1_ref, b1_ref, w2_ref, b2_ref,
                wmulv_ref, bmulv_ref,
                wd1_ref, bd1_ref,
                wd2_ref, bd2_ref, wd3_ref, bd3_ref,
                out_ref, *, lpad, ipad, compute_dtype):
    cd = compute_dtype
    x = x_ref[...]
    cond = cond_ref[...]          # lane-padded to cpad (128 multiple)
    eps = eps_ref[...]            # lane-padded to lpad (128 multiple), zeros in pad

    def mm(a, w_ref):
        # Weights are pre-cast to compute_dtype in the wrapper; only the activation
        # is cast here. Accumulation always f32 on the MXU.
        return jnp.dot(a.astype(cd), w_ref[...], preferred_element_type=jnp.float32)

    # --- encoder: Linear -> ReLU -> Linear -> ReLU (elementwise stays f32) ---
    h = jnp.maximum(mm(x, w1_ref) + b1_ref[...], 0.0)
    h = jnp.maximum(mm(h, w2_ref) + b2_ref[...], 0.0)

    # --- fused mu/logvar head, each head padded to a full 128-lane tile ---
    ml = mm(h, wmulv_ref) + bmulv_ref[...]          # [bm, 2*lpad]
    mu = ml[:, :lpad]                               # 128-aligned free view
    logvar = ml[:, lpad:]                           # 128-aligned free view

    # --- reparameterize: z = mu + eps * exp(0.5*logvar) (f32 on VPU/EUP) ---
    # Padded lanes: weight/bias cols are 0 -> logvar_pad = 0, eps_pad = 0 -> z_pad = 0.
    z = mu + eps * jnp.exp(0.5 * logvar)

    # --- decoder: single matmul over concat([z, cond]) (tile-aligned concat),
    #     then ReLU, Linear -> ReLU, Linear (recon head lane-padded) ---
    zc = jnp.concatenate([z, cond], axis=-1)        # [bm, lpad + cpad]
    d = jnp.maximum(mm(zc, wd1_ref) + bd1_ref[...], 0.0)
    d = jnp.maximum(mm(d, wd2_ref) + bd2_ref[...], 0.0)
    recon = mm(d, wd3_ref) + bd3_ref[...]           # [bm, ipad]

    # --- lane-dense output slab: two full-tile-aligned stores, no concat copy ---
    out_ref[:, :ipad] = recon
    out_ref[:, ipad:] = ml


# ---------------------------------------------------------------------------
# Parameter handling
# ---------------------------------------------------------------------------
def init_params(key, input_dim, latent_dim, condition_dim, hidden_layers):
    """Natural-shape parameters matching the PyTorch module ([in, out] layout)."""
    h0, h1 = hidden_layers
    layers = {
        "1": (input_dim, h0),
        "2": (h0, h1),
        "mu": (h1, latent_dim),
        "lv": (h1, latent_dim),
        "d1": (latent_dim + condition_dim, h1),
        "d2": (h1, h0),
        "d3": (h0, input_dim),
    }
    params = {}
    keys = jax.random.split(key, len(layers))
    for k, (name, (fi, fo)) in zip(keys, layers.items()):
        kw, kb = jax.random.split(k)
        bound = 1.0 / float(fi) ** 0.5   # PyTorch nn.Linear default init bound
        params["w" + name] = jax.random.uniform(kw, (fi, fo), jnp.float32, -bound, bound)
        params["b" + name] = jax.random.uniform(kb, (1, fo), jnp.float32, -bound, bound)
    return params


def prepare_params(params, input_dim, latent_dim, condition_dim,
                   compute_dtype=jnp.float32):
    """One-time prep: fuse mu/logvar head, lane-pad heads, pre-cast matmul weights.

    Padded weight/bias entries are zero, so padded output lanes are exactly zero and
    never contaminate valid lanes. Biases stay f32 (added after f32 accumulation).
    """
    cd = compute_dtype
    lpad = _round_up(latent_dim, LANE)
    cpad = _round_up(condition_dim, LANE)
    ipad = _round_up(input_dim, LANE)
    h1 = params["w2"].shape[1]
    h0 = params["wd3"].shape[0]

    # Fused, lane-padded mu/logvar head: cols [mu | 0... | logvar | 0...]
    wmulv = jnp.zeros((h1, 2 * lpad), jnp.float32)
    wmulv = wmulv.at[:, :latent_dim].set(params["wmu"])
    wmulv = wmulv.at[:, lpad:lpad + latent_dim].set(params["wlv"])
    bmulv = jnp.zeros((1, 2 * lpad), jnp.float32)
    bmulv = bmulv.at[:, :latent_dim].set(params["bmu"])
    bmulv = bmulv.at[:, lpad:lpad + latent_dim].set(params["blv"])

    # Decoder layer 1 over concat([z_pad, cond_pad]): rows [z | 0... | cond | 0...]
    wd1 = jnp.zeros((lpad + cpad, h1), jnp.float32)
    wd1 = wd1.at[:latent_dim, :].set(params["wd1"][:latent_dim])
    wd1 = wd1.at[lpad:lpad + condition_dim, :].set(params["wd1"][latent_dim:])

    # Lane-padded recon head.
    wd3 = jnp.zeros((h0, ipad), jnp.float32).at[:, :input_dim].set(params["wd3"])
    bd3 = jnp.zeros((1, ipad), jnp.float32).at[:, :input_dim].set(params["bd3"])

    return {
        "w1": params["w1"].astype(cd), "b1": params["b1"],
        "w2": params["w2"].astype(cd), "b2": params["b2"],
        "wmulv": wmulv.astype(cd), "bmulv": bmulv,
        "wd1": wd1.astype(cd), "bd1": params["bd1"],
        "wd2": params["wd2"].astype(cd), "bd2": params["bd2"],
        "wd3": wd3.astype(cd), "bd3": bd3,
    }


# ---------------------------------------------------------------------------
# Wrapper
# ---------------------------------------------------------------------------
def cvae_forward(x, condition, eps, kparams, *, block_batch=None):
    """Full CVAE forward in one batch-tiled Pallas call.

    Returns (recon_x, mu, logvar), matching the PyTorch module's forward(). The
    Gaussian noise `eps` (torch.randn_like in the reference) is supplied by the
    caller so the kernel stays deterministic.
    """
    batch, input_dim = x.shape
    cond_dim = condition.shape[1]
    latent_dim = eps.shape[1]

    lpad = kparams["wmulv"].shape[1] // 2
    ipad = kparams["wd3"].shape[1]
    cpad = kparams["wd1"].shape[0] - lpad
    out_width = ipad + 2 * lpad
    compute_dtype = jnp.dtype(kparams["w1"].dtype)

    # Lane-pad only the tiny latent/condition streams (zeros -> padded z lanes stay 0).
    if latent_dim != lpad:
        eps = jnp.pad(eps, ((0, 0), (0, lpad - latent_dim)))
    if cond_dim != cpad:
        condition = jnp.pad(condition, ((0, 0), (0, cpad - cond_dim)))

    vmem_cap = _vmem_capacity_bytes()
    if block_batch is None:
        # 128 MiB VMEM parts (v5e/v6e) take bigger tiles; 64 MiB/TC (v7x) stays at 512.
        cap = 1024 if vmem_cap >= (96 << 20) else 512
        block_batch = min(cap, _round_up(batch, 8))
    block_batch = _round_up(block_batch, 8)

    # No batch padding: ragged last block reads undefined rows (no cross-row mixing;
    # exp() on garbage logvar may be inf there) and its out-of-bounds writes are dropped.
    grid = (pl.cdiv(batch, block_batch),)

    weight_names = ("w1", "b1", "w2", "b2", "wmulv", "bmulv",
                    "wd1", "bd1", "wd2", "bd2", "wd3", "bd3")
    weight_args = tuple(kparams[n] for n in weight_names)
    args = (x, condition, eps) + weight_args

    # VMEM budget: 2x weights (covers the no-Buffered(1) fallback), double-buffered
    # per-tile IO, plus headroom; capped below physical capacity for compiler scratch.
    weight_bytes = sum(int(a.size) * a.dtype.itemsize for a in weight_args)
    io_bytes = 4 * block_batch * (input_dim + cpad + lpad + out_width)
    vmem_limit = int(min(0.8 * vmem_cap,
                         max(32 << 20, 2 * weight_bytes + 2 * io_bytes + (8 << 20))))

    kernel = functools.partial(cvae_kernel, lpad=lpad, ipad=ipad,
                               compute_dtype=compute_dtype)

    def build(single_buffer_weights):
        def row_spec(feat):
            return pl.BlockSpec((block_batch, feat), lambda i: (i, 0))

        if single_buffer_weights:
            def resident_spec(arr):
                # Constant index_map + single buffer: weights stay resident in VMEM
                # across grid steps without the default 2x double-buffer cost.
                return pl.BlockSpec(arr.shape, lambda i: (0, 0),
                                    pipeline_mode=pl.Buffered(1))
        else:
            def resident_spec(arr):
                return pl.BlockSpec(arr.shape, lambda i: (0, 0))

        in_specs = [row_spec(input_dim), row_spec(cpad), row_spec(lpad)]
        in_specs += [resident_spec(a) for a in weight_args]
        out_spec = pl.BlockSpec((block_batch, out_width), lambda i: (i, 0))

        return pl.pallas_call(
            kernel,
            out_shape=jax.ShapeDtypeStruct((batch, out_width), jnp.float32),
            grid_spec=pltpu.PrefetchScalarGridSpec(
                num_scalar_prefetch=0,
                grid=grid,
                in_specs=in_specs,
                out_specs=out_spec,
            ),
            compiler_params=pltpu.CompilerParams(
                dimension_semantics=("parallel",),   # v7x megacore shards the batch grid
                vmem_limit_bytes=vmem_limit,
            ),
        )

    try:
        out = build(True)(*args)
    except Exception:
        # TODO(synk): drop fallback once pl.Buffered(1) on resident weights is
        # confirmed supported across all target JAX/libtpu builds.
        out = build(False)(*args)

    recon = out[:, :input_dim]
    mu = out[:, ipad:ipad + latent_dim]
    logvar = out[:, ipad + lpad:ipad + lpad + latent_dim]
    return recon, mu, logvar


# ---------------------------------------------------------------------------
# Pure-JAX reference (natural, unpadded params — mirrors the PyTorch module)
# ---------------------------------------------------------------------------
def reference_forward(x, condition, eps, p):
    relu = lambda v: jnp.maximum(v, 0.0)
    h = relu(x @ p["w1"] + p["b1"])
    h = relu(h @ p["w2"] + p["b2"])
    mu = h @ p["wmu"] + p["bmu"]
    logvar = h @ p["wlv"] + p["blv"]
    z = mu + eps * jnp.exp(0.5 * logvar)
    d = relu(jnp.concatenate([z, condition], axis=1) @ p["wd1"] + p["bd1"])
    d = relu(d @ p["wd2"] + p["bd2"])
    recon = d @ p["wd3"] + p["bd3"]
    return recon, mu, logvar


if __name__ == "__main__":
    # Small shapes consistent with the module: x [batch, input_dim], cond [batch, cond_dim].
    batch, input_dim, latent_dim, condition_dim = 8, 16, 8, 4
    hidden_layers = (32, 16)

    key = jax.random.PRNGKey(0)
    kx, kc, keps, kparams = jax.random.split(key, 4)

    x = jax.random.normal(kx, (batch, input_dim), jnp.float32)
    condition = jax.random.normal(kc, (batch, condition_dim), jnp.float32)
    # eps for reparameterize (torch.randn_like) generated deterministically outside.
    # TODO(synk): could draw eps in-kernel via pltpu.prng_seed + pltpu.stateful_normal
    # (scalar-prefetch seed) to drop the eps input DMA stream entirely.
    eps = jax.random.normal(keps, (batch, latent_dim), jnp.float32)

    params = init_params(kparams, input_dim, latent_dim, condition_dim, hidden_layers)

    # 1) f32 path, single grid step — matches the pure-JAX reference.
    kp32 = prepare_params(params, input_dim, latent_dim, condition_dim, jnp.float32)
    recon_x, mu, logvar = cvae_forward(x, condition, eps, kp32)
    jax.block_until_ready((recon_x, mu, logvar))
    r_ref, mu_ref, lv_ref = reference_forward(x, condition, eps, params)
    assert recon_x.shape == (batch, input_dim)
    assert mu.shape == (batch, latent_dim) and logvar.shape == (batch, latent_dim)
    assert jnp.allclose(recon_x, r_ref, atol=2e-5, rtol=2e-5)
    assert jnp.allclose(mu, mu_ref, atol=2e-5, rtol=2e-5)
    assert jnp.allclose(logvar, lv_ref, atol=2e-5, rtol=2e-5)

    # 2) multi-step pipelined grid with a ragged last block (no wrapper batch pad).
    batch2 = 20
    k2x, k2c, k2e = jax.random.split(jax.random.PRNGKey(1), 3)
    x2 = jax.random.normal(k2x, (batch2, input_dim), jnp.float32)
    c2 = jax.random.normal(k2c, (batch2, condition_dim), jnp.float32)
    e2 = jax.random.normal(k2e, (batch2, latent_dim), jnp.float32)
    r2, mu2, lv2 = cvae_forward(x2, c2, e2, kp32, block_batch=8)
    jax.block_until_ready((r2, mu2, lv2))
    r2_ref, mu2_r, lv2_r = reference_forward(x2, c2, e2, params)
    assert r2.shape == (batch2, input_dim)
    assert jnp.allclose(r2, r2_ref, atol=2e-5, rtol=2e-5)
    assert jnp.allclose(mu2, mu2_r, atol=2e-5, rtol=2e-5)
    assert jnp.allclose(lv2, lv2_r, atol=2e-5, rtol=2e-5)

    # 3) bf16 pre-cast weights (v6e/v7x MXU perf path), f32 elementwise — loose tol.
    kpbf = prepare_params(params, input_dim, latent_dim, condition_dim, jnp.bfloat16)
    rb, mub, lvb = cvae_forward(x, condition, eps, kpbf)
    jax.block_until_ready((rb, mub, lvb))
    assert bool(jnp.all(jnp.isfinite(rb)))
    assert float(jnp.max(jnp.abs(rb - r_ref))) < 0.25
    assert float(jnp.max(jnp.abs(mub - mu_ref))) < 0.25

    print("KERNEL_OK")
</pallas_src>

<mosaic_0001>
module attributes {stable_mosaic.version = 11 : i64} {
  func.func @cvae_kernel(%arg0: i32, %arg1: memref<8x16xf32, #tpu.memory_space<vmem>>, %arg2: memref<8x128xf32, #tpu.memory_space<vmem>>, %arg3: memref<8x128xf32, #tpu.memory_space<vmem>>, %arg4: memref<16x32xf32, #tpu.memory_space<vmem>>, %arg5: memref<1x32xf32, #tpu.memory_space<vmem>>, %arg6: memref<32x16xf32, #tpu.memory_space<vmem>>, %arg7: memref<1x16xf32, #tpu.memory_space<vmem>>, %arg8: memref<16x256xf32, #tpu.memory_space<vmem>>, %arg9: memref<1x256xf32, #tpu.memory_space<vmem>>, %arg10: memref<256x16xf32, #tpu.memory_space<vmem>>, %arg11: memref<1x16xf32, #tpu.memory_space<vmem>>, %arg12: memref<16x32xf32, #tpu.memory_space<vmem>>, %arg13: memref<1x32xf32, #tpu.memory_space<vmem>>, %arg14: memref<32x128xf32, #tpu.memory_space<vmem>>, %arg15: memref<1x128xf32, #tpu.memory_space<vmem>>, %arg16: memref<8x384xf32, #tpu.memory_space<vmem>>) attributes {dimension_semantics = [#tpu.dimension_semantics<parallel>], iteration_bounds = array<i64: 1>, scalar_prefetch = 0 : i64, scratch_operands = 0 : i64, tpu.core_type = #tpu.core_type<tc>, window_params = [{transform_indices = @transform_0, window_bounds = array<i64: 8, 16>}, {transform_indices = @transform_1, window_bounds = array<i64: 8, 128>}, {transform_indices = @transform_2, window_bounds = array<i64: 8, 128>}, {pipeline_mode = #tpu.pipeline_mode<synchronous>, transform_indices = @transform_3, window_bounds = array<i64: 16, 32>}, {pipeline_mode = #tpu.pipeline_mode<synchronous>, transform_indices = @transform_4, window_bounds = array<i64: 1, 32>}, {pipeline_mode = #tpu.pipeline_mode<synchronous>, transform_indices = @transform_5, window_bounds = array<i64: 32, 16>}, {pipeline_mode = #tpu.pipeline_mode<synchronous>, transform_indices = @transform_6, window_bounds = array<i64: 1, 16>}, {pipeline_mode = #tpu.pipeline_mode<synchronous>, transform_indices = @transform_7, window_bounds = array<i64: 16, 256>}, {pipeline_mode = #tpu.pipeline_mode<synchronous>, transform_indices = @transform_8, window_bounds = array<i64: 1, 256>}, {pipeline_mode = #tpu.pipeline_mode<synchronous>, transform_indices = @transform_9, window_bounds = array<i64: 256, 16>}, {pipeline_mode = #tpu.pipeline_mode<synchronous>, transform_indices = @transform_10, window_bounds = array<i64: 1, 16>}, {pipeline_mode = #tpu.pipeline_mode<synchronous>, transform_indices = @transform_11, window_bounds = array<i64: 16, 32>}, {pipeline_mode = #tpu.pipeline_mode<synchronous>, transform_indices = @transform_12, window_bounds = array<i64: 1, 32>}, {pipeline_mode = #tpu.pipeline_mode<synchronous>, transform_indices = @transform_13, window_bounds = array<i64: 32, 128>}, {pipeline_mode = #tpu.pipeline_mode<synchronous>, transform_indices = @transform_14, window_bounds = array<i64: 1, 128>}, {transform_indices = @transform_15, window_bounds = array<i64: 8, 384>}]} {
    %c0 = arith.constant 0 : index
    %c0_0 = arith.constant 0 : index
    %0 = vector.load %arg1[%c0, %c0_0] : memref<8x16xf32, #tpu.memory_space<vmem>>, vector<8x16xf32>
    %c0_1 = arith.constant 0 : index
    %c0_2 = arith.constant 0 : index
    %1 = vector.load %arg2[%c0_1, %c0_2] : memref<8x128xf32, #tpu.memory_space<vmem>>, vector<8x128xf32>
    %c0_3 = arith.constant 0 : index
    %c0_4 = arith.constant 0 : index
    %2 = vector.load %arg3[%c0_3, %c0_4] : memref<8x128xf32, #tpu.memory_space<vmem>>, vector<8x128xf32>
    %c0_5 = arith.constant 0 : index
    %c0_6 = arith.constant 0 : index
    %3 = vector.load %arg4[%c0_5, %c0_6] : memref<16x32xf32, #tpu.memory_space<vmem>>, vector<16x32xf32>
    %cst = arith.constant dense<0.000000e+00> : vector<8x32xf32>
    %4 = tpu.matmul %0, %3, %cst {dimension_numbers = #tpu.dot_dimension_numbers<[1], [0], [0], [1], [0, 0, 1, 1], [], []>} : vector<8x16xf32>, vector<16x32xf32>, vector<8x32xf32> -> vector<8x32xf32>
    %c0_7 = arith.constant 0 : index
    %c0_8 = arith.constant 0 : index
    %5 = vector.load %arg5[%c0_7, %c0_8] : memref<1x32xf32, #tpu.memory_space<vmem>>, vector<1x32xf32>
    %6 = vector.broadcast %5 : vector<1x32xf32> to vector<8x32xf32>
    %7 = arith.addf %4, %6 : vector<8x32xf32>
    %cst_9 = arith.constant 0.000000e+00 : f32
    %8 = vector.broadcast %cst_9 : f32 to vector<8x32xf32>
    %9 = arith.maximumf %7, %8 : vector<8x32xf32>
    %c0_10 = arith.constant 0 : index
    %c0_11 = arith.constant 0 : index
    %10 = vector.load %arg6[%c0_10, %c0_11] : memref<32x16xf32, #tpu.memory_space<vmem>>, vector<32x16xf32>
    %cst_12 = arith.constant dense<0.000000e+00> : vector<8x16xf32>
    %11 = tpu.matmul %9, %10, %cst_12 {dimension_numbers = #tpu.dot_dimension_numbers<[1], [0], [0], [1], [0, 0, 1, 1], [], []>} : vector<8x32xf32>, vector<32x16xf32>, vector<8x16xf32> -> vector<8x16xf32>
    %c0_13 = arith.constant 0 : index
    %c0_14 = arith.constant 0 : index
    %12 = vector.load %arg7[%c0_13, %c0_14] : memref<1x16xf32, #tpu.memory_space<vmem>>, vector<1x16xf32>
    %13 = vector.broadcast %12 : vector<1x16xf32> to vector<8x16xf32>
    %14 = arith.addf %11, %13 : vector<8x16xf32>
    %cst_15 = arith.constant 0.000000e+00 : f32
    %15 = vector.broadcast %cst_15 : f32 to vector<8x16xf32>
    %16 = arith.maximumf %14, %15 : vector<8x16xf32>
    %c0_16 = arith.constant 0 : index
    %c0_17 = arith.constant 0 : index
    %17 = vector.load %arg8[%c0_16, %c0_17] : memref<16x256xf32, #tpu.memory_space<vmem>>, vector<16x256xf32>
    %cst_18 = arith.constant dense<0.000000e+00> : vector<8x256xf32>
    %18 = tpu.matmul %16, %17, %cst_18 {dimension_numbers = #tpu.dot_dimension_numbers<[1], [0], [0], [1], [0, 0, 1, 1], [], []>} : vector<8x16xf32>, vector<16x256xf32>, vector<8x256xf32> -> vector<8x256xf32>
    %c0_19 = arith.constant 0 : index
    %c0_20 = arith.constant 0 : index
    %19 = vector.load %arg9[%c0_19, %c0_20] : memref<1x256xf32, #tpu.memory_space<vmem>>, vector<1x256xf32>
    %20 = vector.broadcast %19 : vector<1x256xf32> to vector<8x256xf32>
    %21 = arith.addf %18, %20 : vector<8x256xf32>
    %22 = vector.extract_strided_slice %21 {offsets = [0, 0], sizes = [8, 128], strides = [1, 1]} : vector<8x256xf32> to vector<8x128xf32>
    %23 = vector.extract_strided_slice %21 {offsets = [0, 128], sizes = [8, 128], strides = [1, 1]} : vector<8x256xf32> to vector<8x128xf32>
    %cst_21 = arith.constant 5.000000e-01 : f32
    %24 = vector.broadcast %cst_21 : f32 to vector<8x128xf32>
    %25 = arith.mulf %24, %23 : vector<8x128xf32>
    %26 = math.exp %25 : vector<8x128xf32>
    %27 = arith.mulf %2, %26 : vector<8x128xf32>
    %28 = arith.addf %22, %27 : vector<8x128xf32>
    %29 = tpu.concatenate %28, %1 in 1 : vector<8x128xf32>, vector<8x128xf32> -> vector<8x256xf32>
    %c0_22 = arith.constant 0 : index
    %c0_23 = arith.constant 0 : index
    %30 = vector.load %arg10[%c0_22, %c0_23] : memref<256x16xf32, #tpu.memory_space<vmem>>, vector<256x16xf32>
    %cst_24 = arith.constant dense<0.000000e+00> : vector<8x16xf32>
    %31 = tpu.matmul %29, %30, %cst_24 {dimension_numbers = #tpu.dot_dimension_numbers<[1], [0], [0], [1], [0, 0, 1, 1], [], []>} : vector<8x256xf32>, vector<256x16xf32>, vector<8x16xf32> -> vector<8x16xf32>
    %c0_25 = arith.constant 0 : index
    %c0_26 = arith.constant 0 : index
    %32 = vector.load %arg11[%c0_25, %c0_26] : memref<1x16xf32, #tpu.memory_space<vmem>>, vector<1x16xf32>
    %33 = vector.broadcast %32 : vector<1x16xf32> to vector<8x16xf32>
    %34 = arith.addf %31, %33 : vector<8x16xf32>
    %cst_27 = arith.constant 0.000000e+00 : f32
    %35 = vector.broadcast %cst_27 : f32 to vector<8x16xf32>
    %36 = arith.maximumf %34, %35 : vector<8x16xf32>
    %c0_28 = arith.constant 0 : index
    %c0_29 = arith.constant 0 : index
    %37 = vector.load %arg12[%c0_28, %c0_29] : memref<16x32xf32, #tpu.memory_space<vmem>>, vector<16x32xf32>
    %cst_30 = arith.constant dense<0.000000e+00> : vector<8x32xf32>
    %38 = tpu.matmul %36, %37, %cst_30 {dimension_numbers = #tpu.dot_dimension_numbers<[1], [0], [0], [1], [0, 0, 1, 1], [], []>} : vector<8x16xf32>, vector<16x32xf32>, vector<8x32xf32> -> vector<8x32xf32>
    %c0_31 = arith.constant 0 : index
    %c0_32 = arith.constant 0 : index
    %39 = vector.load %arg13[%c0_31, %c0_32] : memref<1x32xf32, #tpu.memory_space<vmem>>, vector<1x32xf32>
    %40 = vector.broadcast %39 : vector<1x32xf32> to vector<8x32xf32>
    %41 = arith.addf %38, %40 : vector<8x32xf32>
    %cst_33 = arith.constant 0.000000e+00 : f32
    %42 = vector.broadcast %cst_33 : f32 to vector<8x32xf32>
    %43 = arith.maximumf %41, %42 : vector<8x32xf32>
    %c0_34 = arith.constant 0 : index
    %c0_35 = arith.constant 0 : index
    %44 = vector.load %arg14[%c0_34, %c0_35] : memref<32x128xf32, #tpu.memory_space<vmem>>, vector<32x128xf32>
    %cst_36 = arith.constant dense<0.000000e+00> : vector<8x128xf32>
    %45 = tpu.matmul %43, %44, %cst_36 {dimension_numbers = #tpu.dot_dimension_numbers<[1], [0], [0], [1], [0, 0, 1, 1], [], []>} : vector<8x32xf32>, vector<32x128xf32>, vector<8x128xf32> -> vector<8x128xf32>
    %c0_37 = arith.constant 0 : index
    %c0_38 = arith.constant 0 : index
    %46 = vector.load %arg15[%c0_37, %c0_38] : memref<1x128xf32, #tpu.memory_space<vmem>>, vector<1x128xf32>
    %47 = vector.broadcast %46 : vector<1x128xf32> to vector<8x128xf32>
    %48 = arith.addf %45, %47 : vector<8x128xf32>
    %c0_39 = arith.constant 0 : index
    %c0_40 = arith.constant 0 : index
    %49 = vector.load %arg16[%c0_39, %c0_40] : memref<8x384xf32, #tpu.memory_space<vmem>>, vector<8x128xf32>
    tpu.vector_store %arg16[%c0_39, %c0_40], %48 {strides = array<i32>} : memref<8x384xf32, #tpu.memory_space<vmem>>, vector<8x128xf32>,
    %c0_41 = arith.constant 0 : index
    %c128 = arith.constant 128 : index
    %50 = vector.load %arg16[%c0_41, %c128] : memref<8x384xf32, #tpu.memory_space<vmem>>, vector<8x256xf32>
    tpu.vector_store %arg16[%c0_41, %c128], %21 {strides = array<i32>} : memref<8x384xf32, #tpu.memory_space<vmem>>, vector<8x256xf32>,
    return
  }
  func.func @transform_0(%arg0: i32) -> (i32, i32) {
    %c0_i32 = arith.constant 0 : i32
    %c0_i32_0 = arith.constant 0 : i32
    return %arg0, %c0_i32 : i32, i32
  }
  func.func @transform_1(%arg0: i32) -> (i32, i32) {
    %c0_i32 = arith.constant 0 : i32
    %c0_i32_0 = arith.constant 0 : i32
    return %arg0, %c0_i32 : i32, i32
  }
  func.func @transform_2(%arg0: i32) -> (i32, i32) {
    %c0_i32 = arith.constant 0 : i32
    %c0_i32_0 = arith.constant 0 : i32
    return %arg0, %c0_i32 : i32, i32
  }
  func.func @transform_3(%arg0: i32) -> (i32, i32) {
    %c0_i32 = arith.constant 0 : i32
    %c0_i32_0 = arith.constant 0 : i32
    %c0_i32_1 = arith.constant 0 : i32
    return %c0_i32, %c0_i32_0 : i32, i32
  }
  func.func @transform_4(%arg0: i32) -> (i32, i32) {
    %c0_i32 = arith.constant 0 : i32
    %c0_i32_0 = arith.constant 0 : i32
    %c0_i32_1 = arith.constant 0 : i32
    return %c0_i32, %c0_i32_0 : i32, i32
  }
  func.func @transform_5(%arg0: i32) -> (i32, i32) {
    %c0_i32 = arith.constant 0 : i32
    %c0_i32_0 = arith.constant 0 : i32
    %c0_i32_1 = arith.constant 0 : i32
    return %c0_i32, %c0_i32_0 : i32, i32
  }
  func.func @transform_6(%arg0: i32) -> (i32, i32) {
    %c0_i32 = arith.constant 0 : i32
    %c0_i32_0 = arith.constant 0 : i32
    %c0_i32_1 = arith.constant 0 : i32
    return %c0_i32, %c0_i32_0 : i32, i32
  }
  func.func @transform_7(%arg0: i32) -> (i32, i32) {
    %c0_i32 = arith.constant 0 : i32
    %c0_i32_0 = arith.constant 0 : i32
    %c0_i32_1 = arith.constant 0 : i32
    return %c0_i32, %c0_i32_0 : i32, i32
  }
  func.func @transform_8(%arg0: i32) -> (i32, i32) {
    %c0_i32 = arith.constant 0 : i32
    %c0_i32_0 = arith.constant 0 : i32
    %c0_i32_1 = arith.constant 0 : i32
    return %c0_i32, %c0_i32_0 : i32, i32
  }
  func.func @transform_9(%arg0: i32) -> (i32, i32) {
    %c0_i32 = arith.constant 0 : i32
    %c0_i32_0 = arith.constant 0 : i32
    %c0_i32_1 = arith.constant 0 : i32
    return %c0_i32, %c0_i32_0 : i32, i32
  }
  func.func @transform_10(%arg0: i32) -> (i32, i32) {
    %c0_i32 = arith.constant 0 : i32
    %c0_i32_0 = arith.constant 0 : i32
    %c0_i32_1 = arith.constant 0 : i32
    return %c0_i32, %c0_i32_0 : i32, i32
  }
  func.func @transform_11(%arg0: i32) -> (i32, i32) {
    %c0_i32 = arith.constant 0 : i32
    %c0_i32_0 = arith.constant 0 : i32
    %c0_i32_1 = arith.constant 0 : i32
    return %c0_i32, %c0_i32_0 : i32, i32
  }
  func.func @transform_12(%arg0: i32) -> (i32, i32) {
    %c0_i32 = arith.constant 0 : i32
    %c0_i32_0 = arith.constant 0 : i32
    %c0_i32_1 = arith.constant 0 : i32
    return %c0_i32, %c0_i32_0 : i32, i32
  }
  func.func @transform_13(%arg0: i32) -> (i32, i32) {
    %c0_i32 = arith.constant 0 : i32
    %c0_i32_0 = arith.constant 0 : i32
    %c0_i32_1 = arith.constant 0 : i32
    return %c0_i32, %c0_i32_0 : i32, i32
  }
  func.func @transform_14(%arg0: i32) -> (i32, i32) {
    %c0_i32 = arith.constant 0 : i32
    %c0_i32_0 = arith.constant 0 : i32
    %c0_i32_1 = arith.constant 0 : i32
    return %c0_i32, %c0_i32_0 : i32, i32
  }
  func.func @transform_15(%arg0: i32) -> (i32, i32) {
    %c0_i32 = arith.constant 0 : i32
    %c0_i32_0 = arith.constant 0 : i32
    return %arg0, %c0_i32 : i32, i32
  }
}

module attributes {stable_mosaic.version = 11 : i64} {
  func.func @cvae_kernel(%arg0: i32, %arg1: memref<8x16xf32, #tpu.memory_space<vmem>>, %arg2: memref<8x128xf32, #tpu.memory_space<vmem>>, %arg3: memref<8x128xf32, #tpu.memory_space<vmem>>, %arg4: memref<16x32xf32, #tpu.memory_space<vmem>>, %arg5: memref<1x32xf32, #tpu.memory_space<vmem>>, %arg6: memref<32x16xf32, #tpu.memory_space<vmem>>, %arg7: memref<1x16xf32, #tpu.memory_space<vmem>>, %arg8: memref<16x256xf32, #tpu.memory_space<vmem>>, %arg9: memref<1x256xf32, #tpu.memory_space<vmem>>, %arg10: memref<256x16xf32, #tpu.memory_space<vmem>>, %arg11: memref<1x16xf32, #tpu.memory_space<vmem>>, %arg12: memref<16x32xf32, #tpu.memory_space<vmem>>, %arg13: memref<1x32xf32, #tpu.memory_space<vmem>>, %arg14: memref<32x128xf32, #tpu.memory_space<vmem>>, %arg15: memref<1x128xf32, #tpu.memory_space<vmem>>, %arg16: memref<8x384xf32, #tpu.memory_space<vmem>>) attributes {dimension_semantics = [#tpu.dimension_semantics<parallel>], iteration_bounds = array<i64: 1>, scalar_prefetch = 0 : i64, scratch_operands = 0 : i64, tpu.core_type = #tpu.core_type<tc>, window_params = [{transform_indices = @transform_0, window_bounds = array<i64: 8, 16>}, {transform_indices = @transform_1, window_bounds = array<i64: 8, 128>}, {transform_indices = @transform_2, window_bounds = array<i64: 8, 128>}, {pipeline_mode = #tpu.pipeline_mode<synchronous>, transform_indices = @transform_3, window_bounds = array<i64: 16, 32>}, {pipeline_mode = #tpu.pipeline_mode<synchronous>, transform_indices = @transform_4, window_bounds = array<i64: 1, 32>}, {pipeline_mode = #tpu.pipeline_mode<synchronous>, transform_indices = @transform_5, window_bounds = array<i64: 32, 16>}, {pipeline_mode = #tpu.pipeline_mode<synchronous>, transform_indices = @transform_6, window_bounds = array<i64: 1, 16>}, {pipeline_mode = #tpu.pipeline_mode<synchronous>, transform_indices = @transform_7, window_bounds = array<i64: 16, 256>}, {pipeline_mode = #tpu.pipeline_mode<synchronous>, transform_indices = @transform_8, window_bounds = array<i64: 1, 256>}, {pipeline_mode = #tpu.pipeline_mode<synchronous>, transform_indices = @transform_9, window_bounds = array<i64: 256, 16>}, {pipeline_mode = #tpu.pipeline_mode<synchronous>, transform_indices = @transform_10, window_bounds = array<i64: 1, 16>}, {pipeline_mode = #tpu.pipeline_mode<synchronous>, transform_indices = @transform_11, window_bounds = array<i64: 16, 32>}, {pipeline_mode = #tpu.pipeline_mode<synchronous>, transform_indices = @transform_12, window_bounds = array<i64: 1, 32>}, {pipeline_mode = #tpu.pipeline_mode<synchronous>, transform_indices = @transform_13, window_bounds = array<i64: 32, 128>}, {pipeline_mode = #tpu.pipeline_mode<synchronous>, transform_indices = @transform_14, window_bounds = array<i64: 1, 128>}, {transform_indices = @transform_15, window_bounds = array<i64: 8, 384>}]} {
    %c0 = arith.constant 0 : index
    %c0_0 = arith.constant 0 : index
    %0 = vector.load %arg1[%c0, %c0_0] : memref<8x16xf32, #tpu.memory_space<vmem>>, vector<8x16xf32>
    %c0_1 = arith.constant 0 : index
    %c0_2 = arith.constant 0 : index
    %1 = vector.load %arg2[%c0_1, %c0_2] : memref<8x128xf32, #tpu.memory_space<vmem>>, vector<8x128xf32>
    %c0_3 = arith.constant 0 : index
    %c0_4 = arith.constant 0 : index
    %2 = vector.load %arg3[%c0_3, %c0_4] : memref<8x128xf32, #tpu.memory_space<vmem>>, vector<8x128xf32>
    %c0_5 = arith.constant 0 : index
    %c0_6 = arith.constant 0 : index
    %3 = vector.load %arg4[%c0_5, %c0_6] : memref<16x32xf32, #tpu.memory_space<vmem>>, vector<16x32xf32>
    %cst = arith.constant dense<0.000000e+00> : vector<8x32xf32>
    %4 = tpu.matmul %0, %3, %cst {dimension_numbers = #tpu.dot_dimension_numbers<[1], [0], [0], [1], [0, 0, 1, 1], [], []>} : vector<8x16xf32>, vector<16x32xf32>, vector<8x32xf32> -> vector<8x32xf32>
    %c0_7 = arith.constant 0 : index
    %c0_8 = arith.constant 0 : index
    %5 = vector.load %arg5[%c0_7, %c0_8] : memref<1x32xf32, #tpu.memory_space<vmem>>, vector<1x32xf32>
    %6 = vector.broadcast %5 : vector<1x32xf32> to vector<8x32xf32>
    %7 = arith.addf %4, %6 : vector<8x32xf32>
    %cst_9 = arith.constant 0.000000e+00 : f32
    %8 = vector.broadcast %cst_9 : f32 to vector<8x32xf32>
    %9 = arith.maximumf %7, %8 : vector<8x32xf32>
    %c0_10 = arith.constant 0 : index
    %c0_11 = arith.constant 0 : index
    %10 = vector.load %arg6[%c0_10, %c0_11] : memref<32x16xf32, #tpu.memory_space<vmem>>, vector<32x16xf32>
    %cst_12 = arith.constant dense<0.000000e+00> : vector<8x16xf32>
    %11 = tpu.matmul %9, %10, %cst_12 {dimension_numbers = #tpu.dot_dimension_numbers<[1], [0], [0], [1], [0, 0, 1, 1], [], []>} : vector<8x32xf32>, vector<32x16xf32>, vector<8x16xf32> -> vector<8x16xf32>
    %c0_13 = arith.constant 0 : index
    %c0_14 = arith.constant 0 : index
    %12 = vector.load %arg7[%c0_13, %c0_14] : memref<1x16xf32, #tpu.memory_space<vmem>>, vector<1x16xf32>
    %13 = vector.broadcast %12 : vector<1x16xf32> to vector<8x16xf32>
    %14 = arith.addf %11, %13 : vector<8x16xf32>
    %cst_15 = arith.constant 0.000000e+00 : f32
    %15 = vector.broadcast %cst_15 : f32 to vector<8x16xf32>
    %16 = arith.maximumf %14, %15 : vector<8x16xf32>
    %c0_16 = arith.constant 0 : index
    %c0_17 = arith.constant 0 : index
    %17 = vector.load %arg8[%c0_16, %c0_17] : memref<16x256xf32, #tpu.memory_space<vmem>>, vector<16x256xf32>
    %cst_18 = arith.constant dense<0.000000e+00> : vector<8x256xf32>
    %18 = tpu.matmul %16, %17, %cst_18 {dimension_numbers = #tpu.dot_dimension_numbers<[1], [0], [0], [1], [0, 0, 1, 1], [], []>} : vector<8x16xf32>, vector<16x256xf32>, vector<8x256xf32> -> vector<8x256xf32>
    %c0_19 = arith.constant 0 : index
    %c0_20 = arith.constant 0 : index
    %19 = vector.load %arg9[%c0_19, %c0_20] : memref<1x256xf32, #tpu.memory_space<vmem>>, vector<1x256xf32>
    %20 = vector.broadcast %19 : vector<1x256xf32> to vector<8x256xf32>
    %21 = arith.addf %18, %20 : vector<8x256xf32>
    %22 = vector.extract_strided_slice %21 {offsets = [0, 0], sizes = [8, 128], strides = [1, 1]} : vector<8x256xf32> to vector<8x128xf32>
    %23 = vector.extract_strided_slice %21 {offsets = [0, 128], sizes = [8, 128], strides = [1, 1]} : vector<8x256xf32> to vector<8x128xf32>
    %cst_21 = arith.constant 5.000000e-01 : f32
    %24 = vector.broadcast %cst_21 : f32 to vector<8x128xf32>
    %25 = arith.mulf %24, %23 : vector<8x128xf32>
    %26 = math.exp %25 : vector<8x128xf32>
    %27 = arith.mulf %2, %26 : vector<8x128xf32>
    %28 = arith.addf %22, %27 : vector<8x128xf32>
    %29 = tpu.concatenate %28, %1 in 1 : vector<8x128xf32>, vector<8x128xf32> -> vector<8x256xf32>
    %c0_22 = arith.constant 0 : index
    %c0_23 = arith.constant 0 : index
    %30 = vector.load %arg10[%c0_22, %c0_23] : memref<256x16xf32, #tpu.memory_space<vmem>>, vector<256x16xf32>
    %cst_24 = arith.constant dense<0.000000e+00> : vector<8x16xf32>
    %31 = tpu.matmul %29, %30, %cst_24 {dimension_numbers = #tpu.dot_dimension_numbers<[1], [0], [0], [1], [0, 0, 1, 1], [], []>} : vector<8x256xf32>, vector<256x16xf32>, vector<8x16xf32> -> vector<8x16xf32>
    %c0_25 = arith.constant 0 : index
    %c0_26 = arith.constant 0 : index
    %32 = vector.load %arg11[%c0_25, %c0_26] : memref<1x16xf32, #tpu.memory_space<vmem>>, vector<1x16xf32>
    %33 = vector.broadcast %32 : vector<1x16xf32> to vector<8x16xf32>
    %34 = arith.addf %31, %33 : vector<8x16xf32>
    %cst_27 = arith.constant 0.000000e+00 : f32
    %35 = vector.broadcast %cst_27 : f32 to vector<8x16xf32>
    %36 = arith.maximumf %34, %35 : vector<8x16xf32>
    %c0_28 = arith.constant 0 : index
    %c0_29 = arith.constant 0 : index
    %37 = vector.load %arg12[%c0_28, %c0_29] : memref<16x32xf32, #tpu.memory_space<vmem>>, vector<16x32xf32>
    %cst_30 = arith.constant dense<0.000000e+00> : vector<8x32xf32>
    %38 = tpu.matmul %36, %37, %cst_30 {dimension_numbers = #tpu.dot_dimension_numbers<[1], [0], [0], [1], [0, 0, 1, 1], [], []>} : vector<8x16xf32>, vector<16x32xf32>, vector<8x32xf32> -> vector<8x32xf32>
    %c0_31 = arith.constant 0 : index
    %c0_32 = arith.constant 0 : index
    %39 = vector.load %arg13[%c0_31, %c0_32] : memref<1x32xf32, #tpu.memory_space<vmem>>, vector<1x32xf32>
    %40 = vector.broadcast %39 : vector<1x32xf32> to vector<8x32xf32>
    %41 = arith.addf %38, %40 : vector<8x32xf32>
    %cst_33 = arith.constant 0.000000e+00 : f32
    %42 = vector.broadcast %cst_33 : f32 to vector<8x32xf32>
    %43 = arith.maximumf %41, %42 : vector<8x32xf32>
    %c0_34 = arith.constant 0 : index
    %c0_35 = arith.constant 0 : index
    %44 = vector.load %arg14[%c0_34, %c0_35] : memref<32x128xf32, #tpu.memory_space<vmem>>, vector<32x128xf32>
    %cst_36 = arith.constant dense<0.000000e+00> : vector<8x128xf32>
    %45 = tpu.matmul %43, %44, %cst_36 {dimension_numbers = #tpu.dot_dimension_numbers<[1], [0], [0], [1], [0, 0, 1, 1], [], []>} : vector<8x32xf32>, vector<32x128xf32>, vector<8x128xf32> -> vector<8x128xf32>
    %c0_37 = arith.constant 0 : index
    %c0_38 = arith.constant 0 : index
    %46 = vector.load %arg15[%c0_37, %c0_38] : memref<1x128xf32, #tpu.memory_space<vmem>>, vector<1x128xf32>
    %47 = vector.broadcast %46 : vector<1x128xf32> to vector<8x128xf32>
    %48 = arith.addf %45, %47 : vector<8x128xf32>
    %c0_39 = arith.constant 0 : index
    %c0_40 = arith.constant 0 : index
    %49 = vector.load %arg16[%c0_39, %c0_40] : memref<8x384xf32, #tpu.memory_space<vmem>>, vector<8x128xf32>
    tpu.vector_store %arg16[%c0_39, %c0_40], %48 {strides = array<i32>} : memref<8x384xf32, #tpu.memory_space<vmem>>, vector<8x128xf32>,
    %c0_41 = arith.constant 0 : index
    %c128 = arith.constant 128 : index
    %50 = vector.load %arg16[%c0_41, %c128] : memref<8x384xf32, #tpu.memory_space<vmem>>, vector<8x256xf32>
    tpu.vector_store %arg16[%c0_41, %c128], %21 {strides = array<i32>} : memref<8x384xf32, #tpu.memory_space<vmem>>, vector<8x256xf32>,
    return
  }
  func.func @transform_0(%arg0: i32) -> (i32, i32) {
    %c0_i32 = arith.constant 0 : i32
    %c0_i32_0 = arith.constant 0 : i32
    return %arg0, %c0_i32 : i32, i32
  }
  func.func @transform_1(%arg0: i32) -> (i32, i32) {
    %c0_i32 = arith.constant 0 : i32
    %c0_i32_0 = arith.constant 0 : i32
    return %arg0, %c0_i32 : i32, i32
  }
  func.func @transform_2(%arg0: i32) -> (i32, i32) {
    %c0_i32 = arith.constant 0 : i32
    %c0_i32_0 = arith.constant 0 : i32
    return %arg0, %c0_i32 : i32, i32
  }
  func.func @transform_3(%arg0: i32) -> (i32, i32) {
    %c0_i32 = arith.constant 0 : i32
    %c0_i32_0 = arith.constant 0 : i32
    %c0_i32_1 = arith.constant 0 : i32
    return %c0_i32, %c0_i32_0 : i32, i32
  }
  func.func @transform_4(%arg0: i32) -> (i32, i32) {
    %c0_i32 = arith.constant 0 : i32
    %c0_i32_0 = arith.constant 0 : i32
    %c0_i32_1 = arith.constant 0 : i32
    return %c0_i32, %c0_i32_0 : i32, i32
  }
  func.func @transform_5(%arg0: i32) -> (i32, i32) {
    %c0_i32 = arith.constant 0 : i32
    %c0_i32_0 = arith.constant 0 : i32
    %c0_i32_1 = arith.constant 0 : i32
    return %c0_i32, %c0_i32_0 : i32, i32
  }
  func.func @transform_6(%arg0: i32) -> (i32, i32) {
    %c0_i32 = arith.constant 0 : i32
    %c0_i32_0 = arith.constant 0 : i32
    %c0_i32_1 = arith.constant 0 : i32
    return %c0_i32, %c0_i32_0 : i32, i32
  }
  func.func @transform_7(%arg0: i32) -> (i32, i32) {
    %c0_i32 = arith.constant 0 : i32
    %c0_i32_0 = arith.constant 0 : i32
    %c0_i32_1 = arith.constant 0 : i32
    return %c0_i32, %c0_i32_0 : i32, i32
  }
  func.func @transform_8(%arg0: i32) -> (i32, i32) {
    %c0_i32 = arith.constant 0 : i32
    %c0_i32_0 = arith.constant 0 : i32
    %c0_i32_1 = arith.constant 0 : i32
    return %c0_i32, %c0_i32_0 : i32, i32
  }
  func.func @transform_9(%arg0: i32) -> (i32, i32) {
    %c0_i32 = arith.constant 0 : i32
    %c0_i32_0 = arith.constant 0 : i32
    %c0_i32_1 = arith.constant 0 : i32
    return %c0_i32, %c0_i32_0 : i32, i32
  }
  func.func @transform_10(%arg0: i32) -> (i32, i32) {
    %c0_i32 = arith.constant 0 : i32
    %c0_i32_0 = arith.constant 0 : i32
    %c0_i32_1 = arith.constant 0 : i32
    return %c0_i32, %c0_i32_0 : i32, i32
  }
  func.func @transform_11(%arg0: i32) -> (i32, i32) {
    %c0_i32 = arith.constant 0 : i32
    %c0_i32_0 = arith.constant 0 : i32
    %c0_i32_1 = arith.constant 0 : i32
    return %c0_i32, %c0_i32_0 : i32, i32
  }
  func.func @transform_12(%arg0: i32) -> (i32, i32) {
    %c0_i32 = arith.constant 0 : i32
    %c0_i32_0 = arith.constant 0 : i32
    %c0_i32_1 = arith.constant 0 : i32
    return %c0_i32, %c0_i32_0 : i32, i32
  }
  func.func @transform_13(%arg0: i32) -> (i32, i32) {
    %c0_i32 = arith.constant 0 : i32
    %c0_i32_0 = arith.constant 0 : i32
    %c0_i32_1 = arith.constant 0 : i32
    return %c0_i32, %c0_i32_0 : i32, i32
  }
  func.func @transform_14(%arg0: i32) -> (i32, i32) {
    %c0_i32 = arith.constant 0 : i32
    %c0_i32_0 = arith.constant 0 : i32
    %c0_i32_1 = arith.constant 0 : i32
    return %c0_i32, %c0_i32_0 : i32, i32
  }
  func.func @transform_15(%arg0: i32) -> (i32, i32) {
    %c0_i32 = arith.constant 0 : i32
    %c0_i32_0 = arith.constant 0 : i32
    return %arg0, %c0_i32 : i32, i32
  }
}

</mosaic_0001>

<bundles_post_ra>
// kernel: tpu_custom_call.1
= control target key start
LH: loop header
LB: loop body
LE: loop exit
PB: predicated region body
PF: predicated region fallthrough
CT: control target
= control target key end

     0   :  { %v794_v2 = vmov 0.0|0.0   ;;  %vm795_vm0 = vmmov 0   ;;  %v796_v4 = vmov 0.0   ;;  %s1081_s0 = inlined_call_operand.vmem [shape: f32[8,16], index: 0, kind: input, shape index: {}]   ;;  %s1082_s1 = inlined_call_operand.vmem [shape: f32[8,128], index: 1, kind: input, shape index: {}]   ;;  %s1083_s2 = inlined_call_operand.vmem [shape: f32[8,128], index: 2, kind: input, shape index: {}]   ;;  %s1084_s3 = inlined_call_operand.vmem [shape: f32[16,32], index: 3, kind: input, shape index: {}]   ;;  %s1085_s4 = inlined_call_operand.vmem [shape: f32[1,32], index: 4, kind: input, shape index: {}]   ;;  %s1086_s5 = inlined_call_operand.vmem [shape: f32[32,16], index: 5, kind: input, shape index: {}]   ;;  %s1087_s6 = inlined_call_operand.vmem [shape: f32[1,16], index: 6, kind: input, shape index: {}]   ;;  %s1088_s7 = inlined_call_operand.vmem [shape: f32[16,256], index: 7, kind: input, shape index: {}]   ;;  %s1089_s8 = inlined_call_operand.vmem [shape: f32[1,256], index: 8, kind: input, shape index: {}]   ;;  %s1090_s9 = inlined_call_operand.vmem [shape: f32[256,16], index: 9, kind: input, shape index: {}]   ;;  %s1091_s10 = inlined_call_operand.vmem [shape: f32[1,16], index: 10, kind: input, shape index: {}]   ;;  %s1092_s11 = inlined_call_operand.vmem [shape: f32[16,32], index: 11, kind: input, shape index: {}]   ;;  %s1093_s12 = inlined_call_operand.vmem [shape: f32[1,32], index: 12, kind: input, shape index: {}]   ;;  %s1094_s13 = inlined_call_operand.vmem [shape: f32[32,128], index: 13, kind: input, shape index: {}]   ;;  %s1095_s14 = inlined_call_operand.vmem [shape: f32[1,128], index: 14, kind: input, shape index: {}]   ;;  %s1096_s15 = inlined_call_operand.hbm [shape: f32[8,384], index: 15, kind: output, shape index: {}]  }
   0x1   :  { %v54_v0 = vld [vmem:[%s1084_s3] sm:$0xff]  ;;  %v55_v1 = vld [vmem:[%s1084_s3 + $0x8] sm:$0xff]  ;;  %710 = vmatprep.subr.bf16.mxu1 %v794_v2  ;;  %678 = vmatprep.mubr.msk.f32.mxu1 %vm795_vm0, %v796_v4 }
   0x2   :  { %v711_v3 = vpack.c.bf16 %v55_v1, %v54_v0  ;;  %v138_v5 = vld [vmem:[%s1086_s5] sm:$0xff]  ;;  %v139_v6 = vld [vmem:[%s1086_s5 + $0x8] sm:$0xff] }
   0x3   :  { %20 = vsyncpa [#allocation3], 0  ;;  %v51_v7 = vld [vmem:[%s1081_s0] sm:$0xff]  ;;  %vm63_vm1 = vcmask 130048   ;;  %v714_v8 = vpack.c.bf16 %v139_v6, %v138_v5  ;;  %v140_v9 = vld [vmem:[%s1086_s5 + $0x10] sm:$0xff]  ;;  %vm149_vm2 = vcmask 261120  }
   0x4   :  { %712 = vmatpush3.bf16.msra.mxu1 %v711_v3  ;;  %v141_v10 = vld [vmem:[%s1086_s5 + $0x18] sm:$0xff]  ;;  %v613_v12 = vld [vmem:[%s1085_s4] ss:$0 sm:$0xff]  ;;  %v225_v17 = vld [vmem:[%s1088_s7 + $0x8] sm:$0xff]  ;;  %s797_s24 = smov [#allocation2]  }
   0x5   :  { %713 = vmatprep.subr.bf16.mxu1 %v794_v2  ;;  %v717_v11 = vpack.c.bf16 %v141_v10, %v140_v9  ;;  %v227_v18 = vld [vmem:[%s1088_s7 + $0x18] sm:$0xff]  ;;  %v224_v20 = vld [vmem:[%s1088_s7] sm:$0xff]  ;;  %v226_v21 = vld [vmem:[%s1088_s7 + $0x10] sm:$0xff]  ;;  %s605_s25 = sshll.u32 %s797_s24, 4  ;;  %s606_s25 = int_to_ptr.vmem [resolvable:$true] %s605_s25 }
   0x6   :  { %v719_v19 = vpack.c.bf16 %v227_v18, %v225_v17  ;;  %v721_v22 = vpack.c.bf16 %v226_v21, %v224_v20  ;;  %v335_v23 = vld [vmem:[%s1090_s9 + $0x80] sm:$0xff]  ;;  %v336_v24 = vld [vmem:[%s1090_s9 + $0x88] sm:$0xff]  ;;  %v337_v28 = vld [vmem:[%s1090_s9 + $0x90] sm:$0xff]  ;;  %p775_p1 = scmp.lt.s32.totalorder %s606_s25, %s606_s25 }
   0x7   :  { %679 = vmatmul.mubr.msk.f32.vlgmr.msra.gmra.mrb[0].mxu1 %vm63_vm1, %v51_v7  ;;  %v319_v25 = vld [vmem:[%s1090_s9] sm:$0xff]  ;;  %v723_v26 = vpack.c.bf16 %v336_v24, %v335_v23  ;;  %v320_v27 = vld [vmem:[%s1090_s9 + $0x8] sm:$0xff]  ;;  %v338_v29 = vld [vmem:[%s1090_s9 + $0x98] sm:$0xff] }
   0x8   :  { %715 = vmatpush3.bf16.msra.mxu1 %v714_v8  ;;  %689 = vmatprep.mubr.msk.f32.mxu1 %vm795_vm0, %v796_v4  ;;  %v725_v30 = vpack.c.bf16 %v320_v27, %v319_v25  ;;  %v727_v31 = vpack.c.bf16 %v338_v29, %v337_v28  ;;  %v321_v32 = vld [vmem:[%s1090_s9 + $0x10] sm:$0xff]  ;;  %v322_v33 = vld [vmem:[%s1090_s9 + $0x18] sm:$0xff]  ;;  %v339_v34 = vld [vmem:[%s1090_s9 + $0xa0] sm:$0xff] }
   0x9   :  { %716 = vmatprep.subr.bf16.mxu1 %v794_v2  ;;  %724 = vmatprep.subr.bf16.mxu0 %v723_v26  ;;  %v340_v35 = vld [vmem:[%s1090_s9 + $0xa8] sm:$0xff]  ;;  %v729_v36 = vpack.c.bf16 %v322_v33, %v321_v32  ;;  %v615_v38 = vld [vmem:[%s1087_s6] ss:$0 sm:$0xff]  ;;  %v341_v46 = vld [vmem:[%s1090_s9 + $0xb0] sm:$0xff] }
   0xa   :  { %726 = vmatpush3.bf16.msra.mxu0 %v725_v30  ;;  %v731_v37 = vpack.c.bf16 %v340_v35, %v339_v34  ;;  %v323_v43 = vld [vmem:[%s1090_s9 + $0x20] sm:$0xff]  ;;  %v324_v44 = vld [vmem:[%s1090_s9 + $0x28] sm:$0xff]  ;;  %v342_v47 = vld [vmem:[%s1090_s9 + $0xb8] sm:$0xff] }
   0xb   :  { %728 = vmatprep.subr.bf16.mxu0 %v727_v31  ;;  %v733_v45 = vpack.c.bf16 %v324_v44, %v323_v43  ;;  %v735_v48 = vpack.c.bf16 %v342_v47, %v341_v46  ;;  %v325_v49 = vld [vmem:[%s1090_s9 + $0x30] sm:$0xff]  ;;  %v326_v50 = vld [vmem:[%s1090_s9 + $0x38] sm:$0xff]  ;;  %v343_v52 = vld [vmem:[%s1090_s9 + $0xc0] sm:$0xff] }
   0xc   :  { %718 = vmatpush3.bf16.msra.mxu1 %v717_v11  ;;  %v737_v51 = vpack.c.bf16 %v326_v50, %v325_v49  ;;  %v344_v53 = vld [vmem:[%s1090_s9 + $0xc8] sm:$0xff]  ;;  %v327_v55 = vld [vmem:[%s1090_s9 + $0x40] sm:$0xff]  ;;  %v345_v58 = vld [vmem:[%s1090_s9 + $0xd0] sm:$0xff] }
   0xd   :  { %720 = vmatprep.subr.bf16.mxu1 %v719_v19  ;;  %v739_v54 = vpack.c.bf16 %v344_v53, %v343_v52  ;;  %v328_v56 = vld [vmem:[%s1090_s9 + $0x48] sm:$0xff]  ;;  %v346_v59 = vld [vmem:[%s1090_s9 + $0xd8] sm:$0xff]  ;;  %v329_v60 = vld [vmem:[%s1090_s9 + $0x50] sm:$0xff] }
   0xe   :  { %730 = vmatpush3.bf16.msra.mxu0 %v729_v36  ;;  %v741_v57 = vpack.c.bf16 %v328_v56, %v327_v55  ;;  %v743_v61 = vpack.c.bf16 %v346_v59, %v345_v58  ;;  %v330_v62 = vld [vmem:[%s1090_s9 + $0x58] sm:$0xff]  ;;  %v347_v63 = vld [vmem:[%s1090_s9 + $0xe0] sm:$0xff]  ;;  %v348_v0 = vld [vmem:[%s1090_s9 + $0xe8] sm:$0xff] }
   0xf   :  { %732 = vmatprep.subr.bf16.mxu0 %v731_v37  ;;  %v745_v1 = vpack.c.bf16 %v330_v62, %v329_v60  ;;  %v747_v3 = vpack.c.bf16 %v348_v0, %v347_v63  ;;  %v331_v5 = vld [vmem:[%s1090_s9 + $0x60] sm:$0xff]  ;;  %v332_v6 = vld [vmem:[%s1090_s9 + $0x68] sm:$0xff]  ;;  %v349_v7 = vld [vmem:[%s1090_s9 + $0xf0] sm:$0xff] }
  0x10   :  { %v350_v8 = vld [vmem:[%s1090_s9 + $0xf8] sm:$0xff]  ;;  %v749_v9 = vpack.c.bf16 %v332_v6, %v331_v5  ;;  %v52_v10 = vld [vmem:[%s1082_s1] sm:$0xff]  ;;  %v430_v33 = vld [vmem:[%s1092_s11 + $0x8] sm:$0xff] }
  0x11   :  { %v751_v11 = vpack.c.bf16 %v350_v8, %v349_v7  ;;  %422 = vmatprep.mubr.f32.mxu0 %v52_v10  ;;  %v228_v18 = vld [vmem:[%s1089_s8] sm:$0x3]  ;;  %v514_v44 = vld [vmem:[%s1094_s13 + $0x10] sm:$0xff] }
  0x12   :  { %734 = vmatpush3.bf16.msra.mxu0 %v733_v45  ;;  %v53_v28 = vld [vmem:[%s1083_s2] sm:$0xff]  ;;  %v515_v45 = vld [vmem:[%s1094_s13 + $0x18] sm:$0xff] }
  0x13   :  { %736 = vmatprep.subr.bf16.mxu0 %v735_v48  ;;  %v429_v32 = vld [vmem:[%s1092_s11] sm:$0xff]  ;;  %v762_v46 = vpack.c.bf16 %v515_v45, %v514_v44 }
  0x14   :  { %v756_v34 = vpack.c.bf16 %v430_v33, %v429_v32  ;;  %v618_v36 = vld [vmem:[%s1091_s10] ss:$0 sm:$0xff] }
  0x15   :  { %v619_v47 = vld [vmem:[%s1093_s12] ss:$0 sm:$0xff] }
  0x16   :  { %738 = vmatpush3.bf16.msra.mxu0 %v737_v51 }
  0x17   :  { %740 = vmatprep.subr.bf16.mxu0 %v739_v54 }
  0x1a   :  { %742 = vmatpush3.bf16.msra.mxu0 %v741_v57 }
  0x1b   :  { %744 = vmatprep.subr.bf16.mxu0 %v743_v61 }
  0x1e   :  { %746 = vmatpush3.bf16.msra.mxu0 %v745_v1 }
  0x1f   :  { %748 = vmatprep.subr.bf16.mxu0 %v747_v3 }
  0x22   :  { %750 = vmatpush3.bf16.msra.mxu0 %v749_v9 }
  0x23   :  { %752 = vmatprep.subr.bf16.mxu0 %v751_v11 }
  0xda   :  { %v133_v13 = vpop.f32.mrb[0].mxu1 }
  0xdb   :  { %v134_v14 = vadd.f32 %v613_v12, %v133_v13  ;;  %v680_v15 = vpop.f32.mrb[1].mxu1  ;;  %v333_v12 = vld [vmem:[%s1090_s9 + $0x70] sm:$0xff]  ;;  %v334_v13 = vld [vmem:[%s1090_s9 + $0x78] sm:$0xff] }
  0xdc   :  { %v230_v15 = vlaneseq }
  0xdd   :  { %v137_v16 = vmax.f32 %v134_v14, 0.0  ;;  %v753_v14 = vpack.c.bf16 %v334_v13, %v333_v12 }
  0xdf   :  { %690 = vmatmul.mubr.msk.f32.vlgmr.msra.gmra.mrb[2].mxu1 %vm149_vm2, %v137_v16  ;;  %754 = vmatpush3.bf16.msra.mxu0 %v753_v14  ;;  %v231_v16 = vshrl.u32 %v230_v15, 7 }
  0xe0   :  { %307 = vmatprep.mubr.f32.mxu1 %v796_v4  ;;  %722 = vmatpush1.bf16.msra.mxu1 %v721_v22 }
  0xe1   :  { %755 = vmatprep.subr.bf16.mxu1 %v794_v2  ;;  %v232_v17 = vsub.s32 0, %v231_v16  ;;  %v236_v19 = vsub.s32 1, %v231_v16 }
  0xe3   :  { %v233_v20 = vrot.slane %v228_v18, %v232_v17  ;;  %v237_v21 = vrot.slane %v228_v18, %v236_v19 }
 0x1b2   :  { %v219_v39 = vpop.f32.mrb[2].mxu1 }
 0x1b3   :  { %v220_v40 = vadd.f32 %v615_v38, %v219_v39  ;;  %v691_v41 = vpop.f32.mrb[3].mxu1  ;;  %v512_v39 = vld [vmem:[%s1094_s13] sm:$0xff] }
 0x1b5   :  { %v223_v42 = vmax.f32 %v220_v40, 0.0  ;;  %v513_v40 = vld [vmem:[%s1094_s13 + $0x8] sm:$0xff]  ;;  %s770_s13 = scalar_lea.vmem %s606_s25, 384 }
 0x1b6   :  { %p771_p0 = scmp.ne.s32.totalorder %s606_s25, %s770_s13  ;;  %p776_p2 = scmp.lt.s32.totalorder %s770_s13, %s770_s13 }
 0x1b7   :  { %617 = vmatmul.mubr.msk.f32.vlgmr.msra.gmra.mrb[4].mxu1 %vm63_vm1, %v223_v42  ;;  %v759_v42 = vpack.c.bf16 %v513_v40, %v512_v39 }
 0x1b8   :  { %696 = vmatprep.mubr.msk.f32.mxu1 %vm795_vm0, %v796_v4  ;;  %757 = vmatpush3.bf16.msra.mxu1 %v756_v34  ;;  %p777_p3 = por %p776_p2, %p775_p1 }
 0x1b9   :  { %758 = vmatprep.subr.bf16.mxu1 %v794_v2 }
 0x1ba   :  { %p778_p4 = pnand %p777_p3, %p771_p0 }
 0x28a   :  { %v309_v22 = vpop.f32.mrb[4].mxu1 }
 0x28b   :  { %v310_v23 = vadd.f32 %v309_v22, %v233_v20  ;;  %v311_v24 = vpop.f32.mrb[5].mxu1 }
 0x28c   :  { %v312_v25 = vadd.f32 %v311_v24, %v237_v21 }
 0x28d   :  { %597 = vst [vmem:[#allocation2 + $0x8] sm:$0xff] %v310_v23 }
 0x28e   :  { %v314_v26 = vmul.f32 0.5, %v312_v25  ;;  %598 = vst [vmem:[#allocation2 + $0x10] sm:$0xff] %v312_v25 }
 0x290   :  { %v315_v27 = vmul.f32 1.442695, %v314_v26 }
 0x292   :  { %768 = vpow2.f32 %v315_v27 }
 0x29c   :  { %v769_v29 = vpop.eup %768 }
 0x29d   :  { %v317_v30 = vmul.f32 %v769_v29, %v53_v28 }
 0x29f   :  { %v318_v31 = vadd.f32 %v317_v30, %v310_v23 }
 0x2a1   :  { %423 = vmatmul.mubr.f32.vlgmr.msra.gmra.mrb[0].mxu0 %v318_v31 }
 0x374   :  { %v663_v35 = vpop.f32.mrb[0].mxu0 }
 0x375   :  { %v664_v37 = vpop.f32.mrb[1].mxu0 }
 0x376   :  { %v665_v38 = vadd.f32 %v664_v37, %v663_v35 }
 0x378   :  { %v425_v41 = vadd.f32 %v665_v38, %v618_v36 }
 0x37a   :  { %v428_v43 = vmax.f32 %v425_v41, 0.0 }
 0x37c   :  { %697 = vmatmul.mubr.msk.f32.vlgmr.msra.gmra.mrb[6].mxu1 %vm63_vm1, %v428_v43 }
 0x37d   :  { %760 = vmatpush3.bf16.msra.mxu1 %v759_v42  ;;  %707 = vmatprep.mubr.msk.f32.mxu1 %vm795_vm0, %v796_v4 }
 0x37e   :  { %761 = vmatprep.subr.bf16.mxu1 %v794_v2  ;;  %v621_v2 = vld [vmem:[%s1095_s14] ss:$0 sm:$0xff] }
 0x381   :  { %763 = vmatpush3.bf16.msra.mxu1 %v762_v46 }
 0x44f   :  { %v507_v48 = vpop.f32.mrb[6].mxu1 }
 0x450   :  { %v508_v49 = vadd.f32 %v619_v47, %v507_v48  ;;  %v698_v50 = vpop.f32.mrb[7].mxu1 }
 0x452   :  { %v511_v4 = vmax.f32 %v508_v49, 0.0 }
 0x454   :  { %708 = vmatmul.mubr.msk.f32.vlgmr.msra.gmra.mrb[8].mxu1 %vm149_vm2, %v511_v4 }
 0x527   :  { %v592_v51 = vpop.f32.mrb[8].mxu1 }
 0x528   :  { %v593_v52 = vadd.f32 %v621_v2, %v592_v51  ;;  %v709_v53 = vpop.f32.mrb[9].mxu1 }
 0x52a   :  { %596 = vst [vmem:[#allocation2] sm:$0xff] %v593_v52 }
 0x52b   :  { %781 = shalt.err (!%p778_p4)
}
 0x52c   :  { %s782_s26 = scalar_lea.hbm %s1096_s15, 384 }
 0x52d   :  { %p783_p5 = scmp.ne.s32.totalorder %s1096_s15, %s782_s26  ;;  %p786_p6 = scmp.lt.u32.totalorder %s782_s26, %s1096_s15 }
 0x52f   :  { %p788_p7 = pnand %p786_p6, %p783_p5 }
 0x531   :  { %791 = shalt.err (!%p788_p7)
}
 0x532   :  { %608 = dma.vmem_to_hbm [thread:$0]  %s606_s25, 384, %s1096_s15, [#allocation3]  }
 0x533   :  { %792 = dma.done.wait [#allocation3], 384  }
 0x534   :  { %793 = vsyncadd [#allocation3], 4294966912 }
 0x535   :  { %612 = vsyncpa [#allocation3], 1 }

// kernel: tpu_custom_call.1
= control target key start
LH: loop header
LB: loop body
LE: loop exit
PB: predicated region body
PF: predicated region fallthrough
CT: control target
= control target key end

     0   :  { %v794_v2 = vmov 0.0|0.0   ;;  %vm795_vm0 = vmmov 0   ;;  %v796_v4 = vmov 0.0   ;;  %s1081_s0 = inlined_call_operand.vmem [shape: f32[8,16], index: 0, kind: input, shape index: {}]   ;;  %s1082_s1 = inlined_call_operand.vmem [shape: f32[8,128], index: 1, kind: input, shape index: {}]   ;;  %s1083_s2 = inlined_call_operand.vmem [shape: f32[8,128], index: 2, kind: input, shape index: {}]   ;;  %s1084_s3 = inlined_call_operand.vmem [shape: f32[16,32], index: 3, kind: input, shape index: {}]   ;;  %s1085_s4 = inlined_call_operand.vmem [shape: f32[1,32], index: 4, kind: input, shape index: {}]   ;;  %s1086_s5 = inlined_call_operand.vmem [shape: f32[32,16], index: 5, kind: input, shape index: {}]   ;;  %s1087_s6 = inlined_call_operand.vmem [shape: f32[1,16], index: 6, kind: input, shape index: {}]   ;;  %s1088_s7 = inlined_call_operand.vmem [shape: f32[16,256], index: 7, kind: input, shape index: {}]   ;;  %s1089_s8 = inlined_call_operand.vmem [shape: f32[1,256], index: 8, kind: input, shape index: {}]   ;;  %s1090_s9 = inlined_call_operand.vmem [shape: f32[256,16], index: 9, kind: input, shape index: {}]   ;;  %s1091_s10 = inlined_call_operand.vmem [shape: f32[1,16], index: 10, kind: input, shape index: {}]   ;;  %s1092_s11 = inlined_call_operand.vmem [shape: f32[16,32], index: 11, kind: input, shape index: {}]   ;;  %s1093_s12 = inlined_call_operand.vmem [shape: f32[1,32], index: 12, kind: input, shape index: {}]   ;;  %s1094_s13 = inlined_call_operand.vmem [shape: f32[32,128], index: 13, kind: input, shape index: {}]   ;;  %s1095_s14 = inlined_call_operand.vmem [shape: f32[1,128], index: 14, kind: input, shape index: {}]   ;;  %s1096_s15 = inlined_call_operand.hbm [shape: f32[8,384], index: 15, kind: output, shape index: {}]  }
   0x1   :  { %v54_v0 = vld [vmem:[%s1084_s3] sm:$0xff]  ;;  %v55_v1 = vld [vmem:[%s1084_s3 + $0x8] sm:$0xff]  ;;  %710 = vmatprep.subr.bf16.mxu1 %v794_v2  ;;  %678 = vmatprep.mubr.msk.f32.mxu1 %vm795_vm0, %v796_v4 }
   0x2   :  { %v711_v3 = vpack.c.bf16 %v55_v1, %v54_v0  ;;  %v138_v5 = vld [vmem:[%s1086_s5] sm:$0xff]  ;;  %v139_v6 = vld [vmem:[%s1086_s5 + $0x8] sm:$0xff] }
   0x3   :  { %20 = vsyncpa [#allocation3], 0  ;;  %v51_v7 = vld [vmem:[%s1081_s0] sm:$0xff]  ;;  %vm63_vm1 = vcmask 130048   ;;  %v714_v8 = vpack.c.bf16 %v139_v6, %v138_v5  ;;  %v140_v9 = vld [vmem:[%s1086_s5 + $0x10] sm:$0xff]  ;;  %vm149_vm2 = vcmask 261120  }
   0x4   :  { %712 = vmatpush3.bf16.msra.mxu1 %v711_v3  ;;  %v141_v10 = vld [vmem:[%s1086_s5 + $0x18] sm:$0xff]  ;;  %v613_v12 = vld [vmem:[%s1085_s4] ss:$0 sm:$0xff]  ;;  %v225_v17 = vld [vmem:[%s1088_s7 + $0x8] sm:$0xff]  ;;  %s797_s24 = smov [#allocation2]  }
   0x5   :  { %713 = vmatprep.subr.bf16.mxu1 %v794_v2  ;;  %v717_v11 = vpack.c.bf16 %v141_v10, %v140_v9  ;;  %v227_v18 = vld [vmem:[%s1088_s7 + $0x18] sm:$0xff]  ;;  %v224_v20 = vld [vmem:[%s1088_s7] sm:$0xff]  ;;  %v226_v21 = vld [vmem:[%s1088_s7 + $0x10] sm:$0xff]  ;;  %s605_s25 = sshll.u32 %s797_s24, 4  ;;  %s606_s25 = int_to_ptr.vmem [resolvable:$true] %s605_s25 }
   0x6   :  { %v719_v19 = vpack.c.bf16 %v227_v18, %v225_v17  ;;  %v721_v22 = vpack.c.bf16 %v226_v21, %v224_v20  ;;  %v335_v23 = vld [vmem:[%s1090_s9 + $0x80] sm:$0xff]  ;;  %v336_v24 = vld [vmem:[%s1090_s9 + $0x88] sm:$0xff]  ;;  %v337_v28 = vld [vmem:[%s1090_s9 + $0x90] sm:$0xff]  ;;  %p775_p1 = scmp.lt.s32.totalorder %s606_s25, %s606_s25 }
   0x7   :  { %679 = vmatmul.mubr.msk.f32.vlgmr.msra.gmra.mrb[0].mxu1 %vm63_vm1, %v51_v7  ;;  %v319_v25 = vld [vmem:[%s1090_s9] sm:$0xff]  ;;  %v723_v26 = vpack.c.bf16 %v336_v24, %v335_v23  ;;  %v320_v27 = vld [vmem:[%s1090_s9 + $0x8] sm:$0xff]  ;;  %v338_v29 = vld [vmem:[%s1090_s9 + $0x98] sm:$0xff] }
   0x8   :  { %715 = vmatpush3.bf16.msra.mxu1 %v714_v8  ;;  %689 = vmatprep.mubr.msk.f32.mxu1 %vm795_vm0, %v796_v4  ;;  %v725_v30 = vpack.c.bf16 %v320_v27, %v319_v25  ;;  %v727_v31 = vpack.c.bf16 %v338_v29, %v337_v28  ;;  %v321_v32 = vld [vmem:[%s1090_s9 + $0x10] sm:$0xff]  ;;  %v322_v33 = vld [vmem:[%s1090_s9 + $0x18] sm:$0xff]  ;;  %v339_v34 = vld [vmem:[%s1090_s9 + $0xa0] sm:$0xff] }
   0x9   :  { %716 = vmatprep.subr.bf16.mxu1 %v794_v2  ;;  %724 = vmatprep.subr.bf16.mxu0 %v723_v26  ;;  %v340_v35 = vld [vmem:[%s1090_s9 + $0xa8] sm:$0xff]  ;;  %v729_v36 = vpack.c.bf16 %v322_v33, %v321_v32  ;;  %v615_v38 = vld [vmem:[%s1087_s6] ss:$0 sm:$0xff]  ;;  %v341_v46 = vld [vmem:[%s1090_s9 + $0xb0] sm:$0xff] }
   0xa   :  { %726 = vmatpush3.bf16.msra.mxu0 %v725_v30  ;;  %v731_v37 = vpack.c.bf16 %v340_v35, %v339_v34  ;;  %v323_v43 = vld [vmem:[%s1090_s9 + $0x20] sm:$0xff]  ;;  %v324_v44 = vld [vmem:[%s1090_s9 + $0x28] sm:$0xff]  ;;  %v342_v47 = vld [vmem:[%s1090_s9 + $0xb8] sm:$0xff] }
   0xb   :  { %728 = vmatprep.subr.bf16.mxu0 %v727_v31  ;;  %v733_v45 = vpack.c.bf16 %v324_v44, %v323_v43  ;;  %v735_v48 = vpack.c.bf16 %v342_v47, %v341_v46  ;;  %v325_v49 = vld [vmem:[%s1090_s9 + $0x30] sm:$0xff]  ;;  %v326_v50 = vld [vmem:[%s1090_s9 + $0x38] sm:$0xff]  ;;  %v343_v52 = vld [vmem:[%s1090_s9 + $0xc0] sm:$0xff] }
   0xc   :  { %718 = vmatpush3.bf16.msra.mxu1 %v717_v11  ;;  %v737_v51 = vpack.c.bf16 %v326_v50, %v325_v49  ;;  %v344_v53 = vld [vmem:[%s1090_s9 + $0xc8] sm:$0xff]  ;;  %v327_v55 = vld [vmem:[%s1090_s9 + $0x40] sm:$0xff]  ;;  %v345_v58 = vld [vmem:[%s1090_s9 + $0xd0] sm:$0xff] }
   0xd   :  { %720 = vmatprep.subr.bf16.mxu1 %v719_v19  ;;  %v739_v54 = vpack.c.bf16 %v344_v53, %v343_v52  ;;  %v328_v56 = vld [vmem:[%s1090_s9 + $0x48] sm:$0xff]  ;;  %v346_v59 = vld [vmem:[%s1090_s9 + $0xd8] sm:$0xff]  ;;  %v329_v60 = vld [vmem:[%s1090_s9 + $0x50] sm:$0xff] }
   0xe   :  { %730 = vmatpush3.bf16.msra.mxu0 %v729_v36  ;;  %v741_v57 = vpack.c.bf16 %v328_v56, %v327_v55  ;;  %v743_v61 = vpack.c.bf16 %v346_v59, %v345_v58  ;;  %v330_v62 = vld [vmem:[%s1090_s9 + $0x58] sm:$0xff]  ;;  %v347_v63 = vld [vmem:[%s1090_s9 + $0xe0] sm:$0xff]  ;;  %v348_v0 = vld [vmem:[%s1090_s9 + $0xe8] sm:$0xff] }
   0xf   :  { %732 = vmatprep.subr.bf16.mxu0 %v731_v37  ;;  %v745_v1 = vpack.c.bf16 %v330_v62, %v329_v60  ;;  %v747_v3 = vpack.c.bf16 %v348_v0, %v347_v63  ;;  %v331_v5 = vld [vmem:[%s1090_s9 + $0x60] sm:$0xff]  ;;  %v332_v6 = vld [vmem:[%s1090_s9 + $0x68] sm:$0xff]  ;;  %v349_v7 = vld [vmem:[%s1090_s9 + $0xf0] sm:$0xff] }
  0x10   :  { %v350_v8 = vld [vmem:[%s1090_s9 + $0xf8] sm:$0xff]  ;;  %v749_v9 = vpack.c.bf16 %v332_v6, %v331_v5  ;;  %v52_v10 = vld [vmem:[%s1082_s1] sm:$0xff]  ;;  %v430_v33 = vld [vmem:[%s1092_s11 + $0x8] sm:$0xff] }
  0x11   :  { %v751_v11 = vpack.c.bf16 %v350_v8, %v349_v7  ;;  %422 = vmatprep.mubr.f32.mxu0 %v52_v10  ;;  %v228_v18 = vld [vmem:[%s1089_s8] sm:$0x3]  ;;  %v514_v44 = vld [vmem:[%s1094_s13 + $0x10] sm:$0xff] }
  0x12   :  { %734 = vmatpush3.bf16.msra.mxu0 %v733_v45  ;;  %v53_v28 = vld [vmem:[%s1083_s2] sm:$0xff]  ;;  %v515_v45 = vld [vmem:[%s1094_s13 + $0x18] sm:$0xff] }
  0x13   :  { %736 = vmatprep.subr.bf16.mxu0 %v735_v48  ;;  %v429_v32 = vld [vmem:[%s1092_s11] sm:$0xff]  ;;  %v762_v46 = vpack.c.bf16 %v515_v45, %v514_v44 }
  0x14   :  { %v756_v34 = vpack.c.bf16 %v430_v33, %v429_v32  ;;  %v618_v36 = vld [vmem:[%s1091_s10] ss:$0 sm:$0xff] }
  0x15   :  { %v619_v47 = vld [vmem:[%s1093_s12] ss:$0 sm:$0xff] }
  0x16   :  { %738 = vmatpush3.bf16.msra.mxu0 %v737_v51 }
  0x17   :  { %740 = vmatprep.subr.bf16.mxu0 %v739_v54 }
  0x1a   :  { %742 = vmatpush3.bf16.msra.mxu0 %v741_v57 }
  0x1b   :  { %744 = vmatprep.subr.bf16.mxu0 %v743_v61 }
  0x1e   :  { %746 = vmatpush3.bf16.msra.mxu0 %v745_v1 }
  0x1f   :  { %748 = vmatprep.subr.bf16.mxu0 %v747_v3 }
  0x22   :  { %750 = vmatpush3.bf16.msra.mxu0 %v749_v9 }
  0x23   :  { %752 = vmatprep.subr.bf16.mxu0 %v751_v11 }
  0xda   :  { %v133_v13 = vpop.f32.mrb[0].mxu1 }
  0xdb   :  { %v134_v14 = vadd.f32 %v613_v12, %v133_v13  ;;  %v680_v15 = vpop.f32.mrb[1].mxu1  ;;  %v333_v12 = vld [vmem:[%s1090_s9 + $0x70] sm:$0xff]  ;;  %v334_v13 = vld [vmem:[%s1090_s9 + $0x78] sm:$0xff] }
  0xdc   :  { %v230_v15 = vlaneseq }
  0xdd   :  { %v137_v16 = vmax.f32 %v134_v14, 0.0  ;;  %v753_v14 = vpack.c.bf16 %v334_v13, %v333_v12 }
  0xdf   :  { %690 = vmatmul.mubr.msk.f32.vlgmr.msra.gmra.mrb[2].mxu1 %vm149_vm2, %v137_v16  ;;  %754 = vmatpush3.bf16.msra.mxu0 %v753_v14  ;;  %v231_v16 = vshrl.u32 %v230_v15, 7 }
  0xe0   :  { %307 = vmatprep.mubr.f32.mxu1 %v796_v4  ;;  %722 = vmatpush1.bf16.msra.mxu1 %v721_v22 }
  0xe1   :  { %755 = vmatprep.subr.bf16.mxu1 %v794_v2  ;;  %v232_v17 = vsub.s32 0, %v231_v16  ;;  %v236_v19 = vsub.s32 1, %v231_v16 }
  0xe3   :  { %v233_v20 = vrot.slane %v228_v18, %v232_v17  ;;  %v237_v21 = vrot.slane %v228_v18, %v236_v19 }
 0x1b2   :  { %v219_v39 = vpop.f32.mrb[2].mxu1 }
 0x1b3   :  { %v220_v40 = vadd.f32 %v615_v38, %v219_v39  ;;  %v691_v41 = vpop.f32.mrb[3].mxu1  ;;  %v512_v39 = vld [vmem:[%s1094_s13] sm:$0xff] }
 0x1b5   :  { %v223_v42 = vmax.f32 %v220_v40, 0.0  ;;  %v513_v40 = vld [vmem:[%s1094_s13 + $0x8] sm:$0xff]  ;;  %s770_s13 = scalar_lea.vmem %s606_s25, 384 }
 0x1b6   :  { %p771_p0 = scmp.ne.s32.totalorder %s606_s25, %s770_s13  ;;  %p776_p2 = scmp.lt.s32.totalorder %s770_s13, %s770_s13 }
 0x1b7   :  { %617 = vmatmul.mubr.msk.f32.vlgmr.msra.gmra.mrb[4].mxu1 %vm63_vm1, %v223_v42  ;;  %v759_v42 = vpack.c.bf16 %v513_v40, %v512_v39 }
 0x1b8   :  { %696 = vmatprep.mubr.msk.f32.mxu1 %vm795_vm0, %v796_v4  ;;  %757 = vmatpush3.bf16.msra.mxu1 %v756_v34  ;;  %p777_p3 = por %p776_p2, %p775_p1 }
 0x1b9   :  { %758 = vmatprep.subr.bf16.mxu1 %v794_v2 }
 0x1ba   :  { %p778_p4 = pnand %p777_p3, %p771_p0 }
 0x28a   :  { %v309_v22 = vpop.f32.mrb[4].mxu1 }
 0x28b   :  { %v310_v23 = vadd.f32 %v309_v22, %v233_v20  ;;  %v311_v24 = vpop.f32.mrb[5].mxu1 }
 0x28c   :  { %v312_v25 = vadd.f32 %v311_v24, %v237_v21 }
 0x28d   :  { %597 = vst [vmem:[#allocation2 + $0x8] sm:$0xff] %v310_v23 }
 0x28e   :  { %v314_v26 = vmul.f32 0.5, %v312_v25  ;;  %598 = vst [vmem:[#allocation2 + $0x10] sm:$0xff] %v312_v25 }
 0x290   :  { %v315_v27 = vmul.f32 1.442695, %v314_v26 }
 0x292   :  { %768 = vpow2.f32 %v315_v27 }
 0x29c   :  { %v769_v29 = vpop.eup %768 }
 0x29d   :  { %v317_v30 = vmul.f32 %v769_v29, %v53_v28 }
 0x29f   :  { %v318_v31 = vadd.f32 %v317_v30, %v310_v23 }
 0x2a1   :  { %423 = vmatmul.mubr.f32.vlgmr.msra.gmra.mrb[0].mxu0 %v318_v31 }
 0x374   :  { %v663_v35 = vpop.f32.mrb[0].mxu0 }
 0x375   :  { %v664_v37 = vpop.f32.mrb[1].mxu0 }
 0x376   :  { %v665_v38 = vadd.f32 %v664_v37, %v663_v35 }
 0x378   :  { %v425_v41 = vadd.f32 %v665_v38, %v618_v36 }
 0x37a   :  { %v428_v43 = vmax.f32 %v425_v41, 0.0 }
 0x37c   :  { %697 = vmatmul.mubr.msk.f32.vlgmr.msra.gmra.mrb[6].mxu1 %vm63_vm1, %v428_v43 }
 0x37d   :  { %760 = vmatpush3.bf16.msra.mxu1 %v759_v42  ;;  %707 = vmatprep.mubr.msk.f32.mxu1 %vm795_vm0, %v796_v4 }
 0x37e   :  { %761 = vmatprep.subr.bf16.mxu1 %v794_v2  ;;  %v621_v2 = vld [vmem:[%s1095_s14] ss:$0 sm:$0xff] }
 0x381   :  { %763 = vmatpush3.bf16.msra.mxu1 %v762_v46 }
 0x44f   :  { %v507_v48 = vpop.f32.mrb[6].mxu1 }
 0x450   :  { %v508_v49 = vadd.f32 %v619_v47, %v507_v48  ;;  %v698_v50 = vpop.f32.mrb[7].mxu1 }
 0x452   :  { %v511_v4 = vmax.f32 %v508_v49, 0.0 }
 0x454   :  { %708 = vmatmul.mubr.msk.f32.vlgmr.msra.gmra.mrb[8].mxu1 %vm149_vm2, %v511_v4 }
 0x527   :  { %v592_v51 = vpop.f32.mrb[8].mxu1 }
 0x528   :  { %v593_v52 = vadd.f32 %v621_v2, %v592_v51  ;;  %v709_v53 = vpop.f32.mrb[9].mxu1 }
 0x52a   :  { %596 = vst [vmem:[#allocation2] sm:$0xff] %v593_v52 }
 0x52b   :  { %781 = shalt.err (!%p778_p4)
}
 0x52c   :  { %s782_s26 = scalar_lea.hbm %s1096_s15, 384 }
 0x52d   :  { %p783_p5 = scmp.ne.s32.totalorder %s1096_s15, %s782_s26  ;;  %p786_p6 = scmp.lt.u32.totalorder %s782_s26, %s1096_s15 }
 0x52f   :  { %p788_p7 = pnand %p786_p6, %p783_p5 }
 0x531   :  { %791 = shalt.err (!%p788_p7)
}
 0x532   :  { %608 = dma.vmem_to_hbm [thread:$0]  %s606_s25, 384, %s1096_s15, [#allocation3]  }
 0x533   :  { %792 = dma.done.wait [#allocation3], 384  }
 0x534   :  { %793 = vsyncadd [#allocation3], 4294966912 }
 0x535   :  { %612 = vsyncpa [#allocation3], 1 }

</bundles_post_ra>
